<compile_context>
chip_gen: v7x
topology: tpu7x:2x2x1
jax: 0.10.0
libtpu: 0.0.40
codegen_flags: <defaults>
</compile_context>

<pallas_src>
import types

import numpy as np
import jax
import jax.numpy as jnp
from jax.experimental import pallas as pl
from jax.experimental.pallas import tpu as pltpu


def _round_up(x, m):
    return ((x + m - 1) // m) * m


def multilayer_mamba(x):
    # TODO(synk): MultiLayerMamba is undefined in the reference; identity
    # stand-in, folded away algebraically in the fused kernel below.
    return x


# ----------------------------------------------------------------------------
# Fused Pallas kernel: one STAR frame-step per row, batched over rows.
#
#   ts = relu([x_norm | x_abs] @ W_emb + b_emb)   block-diag K=4 embed (VPU FMAs)
#        columns [0:emb]  = temporal embedding (relu of Linear(2, emb))
#        columns [emb:2e] = spatial  embedding (relu of Linear(2, emb))
#   o  = ts @ W_proj + b_proj                     fusion+output collapsed (MXU),
#                                                 noise folded into b_proj
# ----------------------------------------------------------------------------
def _star_step_kernel(x_ref, we_ref, be_ref, wp_ref, bp_ref, o_ref):
    x = x_ref[...]                                 # [TM, 4]
    we = we_ref[...]                               # [4, 2*emb] block-diagonal

    # K=4 embedding as broadcast FMAs on the VPU (an MXU contraction of depth 4
    # would waste the systolic array), with fused ReLU.  The temporal/spatial
    # column blocks stay independent because we[0:2, emb:] == we[2:4, :emb] == 0.
    ts = (x[:, 0:1] * we[0:1, :] + x[:, 1:2] * we[1:2, :]
          + x[:, 2:3] * we[2:3, :] + x[:, 3:4] * we[3:4, :] + be_ref[...])
    ts = jnp.maximum(ts, 0.0)

    # Collapsed fusion + output projection: one [TM, 2*emb] @ [2*emb, 2] dot.
    # Output stays 2 columns wide -> minimal HBM writeback traffic.
    o = jnp.dot(ts, wp_ref[...], preferred_element_type=jnp.float32) + bp_ref[...]
    o_ref[...] = o.astype(o_ref.dtype)


def star_step_batched(x_pack, *, W_emb, b_emb, W_proj, b_proj, row_tile=1024):
    """x_pack: [M, 4] f32 rows (x_norm | x_abs) -> [M, 2] STAR-step outputs."""
    M = x_pack.shape[0]
    emb2 = W_emb.shape[1]

    # Padding-aware row tiling: split M into roughly equal tiles no bigger than
    # row_tile, rounded to the sublane (8) granularity.  Force >= 2 grid steps
    # (when M allows) so the "parallel" axis can be sharded across v7x's 2 TCs.
    n_tiles = max(2, pl.cdiv(M, row_tile))
    tm = min(_round_up(pl.cdiv(M, n_tiles), 8), _round_up(M, 8))
    grid = pl.cdiv(M, tm)
    m_pad = grid * tm
    if m_pad != M:
        x_pack = jnp.pad(x_pack, ((0, m_pad - M), (0, 0)))

    def full(shape):
        return pl.BlockSpec(shape, lambda i: (0, 0))

    out = pl.pallas_call(
        _star_step_kernel,
        out_shape=jax.ShapeDtypeStruct((m_pad, 2), jnp.float32),
        grid=(grid,),
        in_specs=[
            pl.BlockSpec((tm, 4), lambda i: (i, 0)),   # packed coords per row
            full((4, emb2)),                            # block-diag embed weight
            full((1, emb2)),                            # embed bias
            full((emb2, 2)),                            # collapsed projection
            full((1, 2)),                               # collapsed bias (+noise)
        ],
        out_specs=pl.BlockSpec((tm, 2), lambda i: (i, 0)),
        compiler_params=pltpu.CompilerParams(
            dimension_semantics=("parallel",)),
    )(x_pack, W_emb, b_emb, W_proj, b_proj)

    return out[:M]


# ----------------------------------------------------------------------------
# STAR forward (iftest=False path), fully batched over frames & pedestrians.
# ----------------------------------------------------------------------------
def init_star_params(key, emb):
    ks = jax.random.split(key, 8)
    s = 0.1
    return {
        "emb": emb,
        # weights stored as [in, out] (transposed vs. torch nn.Linear)
        "W_temp": jax.random.normal(ks[0], (2, emb), jnp.float32) * s,
        "b_temp": jax.random.normal(ks[1], (emb,), jnp.float32) * s,
        "W_spa": jax.random.normal(ks[2], (2, emb), jnp.float32) * s,
        "b_spa": jax.random.normal(ks[3], (emb,), jnp.float32) * s,
        "W_fus": jax.random.normal(ks[4], (2 * emb, emb), jnp.float32) * s,
        "b_fus": jax.random.normal(ks[5], (emb,), jnp.float32) * s,
        "W_out": jax.random.normal(ks[6], (emb + 16, 2), jnp.float32) * s,
        "b_out": jax.random.normal(ks[7], (2,), jnp.float32) * s,
    }


def star_forward(params, inputs, args, noise_key):
    nodes_abs, nodes_norm, shift_value, seq_list, scenes, batch_pednum = inputs
    T, num_ped, _ = nodes_norm.shape
    emb = params["emb"]
    n_steps = args.seq_length - 1

    # --- host-side masking / scene bookkeeping (static, mirrors torch code) --
    seq_np = np.asarray(seq_list) > 0
    # valid[f, n] == pedestrian n present in every frame 0..f (get_node_index)
    valid_np = np.logical_and.accumulate(seq_np, axis=0)[:n_steps]   # [F, N]
    ped_scene = np.zeros((num_ped,), np.int32)
    for si, (st, ed) in enumerate(scenes):
        ped_scene[st:ed + 1] = si
    n_scenes = len(scenes)
    scene_onehot = jnp.asarray(np.eye(n_scenes, dtype=np.float32)[ped_scene])
    valid = jnp.asarray(valid_np.astype(np.float32))                  # [F, N]

    # --- gaussian noise (single shared (1,16) row; folding into the output
    # bias below is exact only because it is shared across all rows) ---------
    noise = jax.random.normal(noise_key, (1, 16), jnp.float32)

    # --- derived (once-per-forward) parameter buffers ------------------------
    emb2 = 2 * emb
    W_emb = jnp.zeros((4, emb2), jnp.float32)
    W_emb = W_emb.at[0:2, :emb].set(params["W_temp"])     # temporal block
    W_emb = W_emb.at[2:4, emb:].set(params["W_spa"])      # spatial block
    b_emb = jnp.concatenate([params["b_temp"], params["b_spa"]])[None, :]
    # TODO(synk): collapsing fusion+output is exact only while MultiLayerMamba
    # is the identity stand-in (no nonlinearity between the two Linears).
    W_proj = params["W_fus"] @ params["W_out"][:emb]                  # [2e, 2]
    b_proj = (params["b_fus"][None, :] @ params["W_out"][:emb]
              + params["b_out"][None, :] + noise @ params["W_out"][emb:])

    # --- per-(frame, scene) mean of absolute coords over frames 0..f ---------
    # Replaces the per-frame, per-scene mean_normalize_abs_input loop with one
    # fused jnp computation (cumsum over time + segment reduction over scenes).
    abs_f = nodes_abs[:n_steps].astype(jnp.float32)                   # [F, N, 2]
    cum_abs = jnp.cumsum(abs_f, axis=0)                               # sum t<=f
    masked_cum = cum_abs * valid[..., None]
    scene_sum = jnp.einsum("fnc,ns->fsc", masked_cum, scene_onehot)   # [F, S, 2]
    scene_cnt = jnp.einsum("fn,ns->fs", valid, scene_onehot)          # [F, S]
    frames = jnp.arange(1, n_steps + 1, dtype=jnp.float32)[:, None]   # (f + 1)
    # NOTE: a scene with zero valid pedestrians at frame f gets mean 0 here;
    # those rows are masked out of the output below, so the un-normalized
    # coordinates they produce are harmless.
    denom = jnp.maximum(scene_cnt * frames, 1.0)[..., None]
    scene_mean = scene_sum / denom                                    # [F, S, 2]
    mean_per_ped = jnp.einsum("fsc,ns->fnc", scene_mean, scene_onehot)
    x_abs = (abs_f - mean_per_ped).reshape(n_steps * num_ped, 2)

    x_norm = nodes_norm[:n_steps].astype(jnp.float32).reshape(
        n_steps * num_ped, 2)
    x_pack = jnp.concatenate([x_norm, x_abs], axis=1)                 # [M, 4]

    # --- one fused Pallas call for every (framenum, pedestrian) row ----------
    out_rows = star_step_batched(
        x_pack, W_emb=W_emb, b_emb=b_emb, W_proj=W_proj, b_proj=b_proj)

    out_frames = out_rows.reshape(n_steps, num_ped, 2)
    out_frames = jnp.where(valid[..., None] > 0, out_frames, 0.0)
    outputs = jnp.zeros((T, num_ped, 2), jnp.float32).at[:n_steps].set(
        out_frames)
    return outputs


# ----------------------------------------------------------------------------
# Driver
# ----------------------------------------------------------------------------
if __name__ == "__main__":
    args = types.SimpleNamespace(seq_length=8, obs_length=4)
    EMB = 32
    T = args.seq_length
    N_PED = 6                       # 2 scenes x 3 pedestrians
    scenes = [(0, 2), (3, 5)]       # inclusive index ranges per scene
    batch_pednum = np.array([3, 3], dtype=np.int32)

    key = jax.random.PRNGKey(0)
    k_abs, k_norm, k_shift, k_par, k_noise = jax.random.split(key, 5)

    nodes_abs = jax.random.normal(k_abs, (T, N_PED, 2), jnp.float32) * 5.0
    nodes_norm = jax.random.normal(k_norm, (T, N_PED, 2), jnp.float32)
    shift_value = jax.random.normal(k_shift, (T, N_PED, 2), jnp.float32)
    seq_list = np.ones((T, N_PED), dtype=np.float32)  # all peds present

    params = init_star_params(k_par, EMB)
    inputs = (nodes_abs, nodes_norm, shift_value, seq_list, scenes, batch_pednum)

    outputs = star_forward(params, inputs, args, noise_key=k_noise)
    outputs = jax.block_until_ready(outputs)
    assert outputs.shape == (T, N_PED, 2)
    assert bool(jnp.all(jnp.isfinite(outputs)))
    print("KERNEL_OK")
</pallas_src>

<mosaic_0001>
module attributes {stable_mosaic.version = 11 : i64} {
  func.func @_star_step_kernel(%arg0: i32, %arg1: memref<24x4xf32, #tpu.memory_space<vmem>>, %arg2: memref<4x64xf32, #tpu.memory_space<vmem>>, %arg3: memref<1x64xf32, #tpu.memory_space<vmem>>, %arg4: memref<64x2xf32, #tpu.memory_space<vmem>>, %arg5: memref<1x2xf32, #tpu.memory_space<vmem>>, %arg6: memref<24x2xf32, #tpu.memory_space<vmem>>) attributes {dimension_semantics = [#tpu.dimension_semantics<parallel>], iteration_bounds = array<i64: 2>, scalar_prefetch = 0 : i64, scratch_operands = 0 : i64, tpu.core_type = #tpu.core_type<tc>, window_params = [{transform_indices = @transform_0, window_bounds = array<i64: 24, 4>}, {pipeline_mode = #tpu.pipeline_mode<synchronous>, transform_indices = @transform_1, window_bounds = array<i64: 4, 64>}, {pipeline_mode = #tpu.pipeline_mode<synchronous>, transform_indices = @transform_2, window_bounds = array<i64: 1, 64>}, {pipeline_mode = #tpu.pipeline_mode<synchronous>, transform_indices = @transform_3, window_bounds = array<i64: 64, 2>}, {pipeline_mode = #tpu.pipeline_mode<synchronous>, transform_indices = @transform_4, window_bounds = array<i64: 1, 2>}, {transform_indices = @transform_5, window_bounds = array<i64: 24, 2>}]} {
    %c0 = arith.constant 0 : index
    %c0_0 = arith.constant 0 : index
    %0 = vector.load %arg1[%c0, %c0_0] : memref<24x4xf32, #tpu.memory_space<vmem>>, vector<24x4xf32>
    %c0_1 = arith.constant 0 : index
    %c0_2 = arith.constant 0 : index
    %1 = vector.load %arg2[%c0_1, %c0_2] : memref<4x64xf32, #tpu.memory_space<vmem>>, vector<4x64xf32>
    %2 = vector.extract_strided_slice %0 {offsets = [0, 0], sizes = [24, 1], strides = [1, 1]} : vector<24x4xf32> to vector<24x1xf32>
    %3 = vector.extract_strided_slice %1 {offsets = [0, 0], sizes = [1, 64], strides = [1, 1]} : vector<4x64xf32> to vector<1x64xf32>
    %4 = vector.broadcast %2 : vector<24x1xf32> to vector<24x64xf32>
    %5 = vector.broadcast %3 : vector<1x64xf32> to vector<24x64xf32>
    %6 = arith.mulf %4, %5 : vector<24x64xf32>
    %7 = vector.extract_strided_slice %0 {offsets = [0, 1], sizes = [24, 1], strides = [1, 1]} : vector<24x4xf32> to vector<24x1xf32>
    %8 = vector.extract_strided_slice %1 {offsets = [1, 0], sizes = [1, 64], strides = [1, 1]} : vector<4x64xf32> to vector<1x64xf32>
    %9 = vector.broadcast %7 : vector<24x1xf32> to vector<24x64xf32>
    %10 = vector.broadcast %8 : vector<1x64xf32> to vector<24x64xf32>
    %11 = arith.mulf %9, %10 : vector<24x64xf32>
    %12 = arith.addf %6, %11 : vector<24x64xf32>
    %13 = vector.extract_strided_slice %0 {offsets = [0, 2], sizes = [24, 1], strides = [1, 1]} : vector<24x4xf32> to vector<24x1xf32>
    %14 = vector.extract_strided_slice %1 {offsets = [2, 0], sizes = [1, 64], strides = [1, 1]} : vector<4x64xf32> to vector<1x64xf32>
    %15 = vector.broadcast %13 : vector<24x1xf32> to vector<24x64xf32>
    %16 = vector.broadcast %14 : vector<1x64xf32> to vector<24x64xf32>
    %17 = arith.mulf %15, %16 : vector<24x64xf32>
    %18 = arith.addf %12, %17 : vector<24x64xf32>
    %19 = vector.extract_strided_slice %0 {offsets = [0, 3], sizes = [24, 1], strides = [1, 1]} : vector<24x4xf32> to vector<24x1xf32>
    %20 = vector.extract_strided_slice %1 {offsets = [3, 0], sizes = [1, 64], strides = [1, 1]} : vector<4x64xf32> to vector<1x64xf32>
    %21 = vector.broadcast %19 : vector<24x1xf32> to vector<24x64xf32>
    %22 = vector.broadcast %20 : vector<1x64xf32> to vector<24x64xf32>
    %23 = arith.mulf %21, %22 : vector<24x64xf32>
    %24 = arith.addf %18, %23 : vector<24x64xf32>
    %c0_3 = arith.constant 0 : index
    %c0_4 = arith.constant 0 : index
    %25 = vector.load %arg3[%c0_3, %c0_4] : memref<1x64xf32, #tpu.memory_space<vmem>>, vector<1x64xf32>
    %26 = vector.broadcast %25 : vector<1x64xf32> to vector<24x64xf32>
    %27 = arith.addf %24, %26 : vector<24x64xf32>
    %cst = arith.constant 0.000000e+00 : f32
    %28 = vector.broadcast %cst : f32 to vector<24x64xf32>
    %29 = arith.maximumf %27, %28 : vector<24x64xf32>
    %c0_5 = arith.constant 0 : index
    %c0_6 = arith.constant 0 : index
    %30 = vector.load %arg4[%c0_5, %c0_6] : memref<64x2xf32, #tpu.memory_space<vmem>>, vector<64x2xf32>
    %cst_7 = arith.constant dense<0.000000e+00> : vector<24x2xf32>
    %31 = tpu.matmul %29, %30, %cst_7 {dimension_numbers = #tpu.dot_dimension_numbers<[1], [0], [0], [1], [0, 0, 1, 1], [], []>} : vector<24x64xf32>, vector<64x2xf32>, vector<24x2xf32> -> vector<24x2xf32>
    %c0_8 = arith.constant 0 : index
    %c0_9 = arith.constant 0 : index
    %32 = vector.load %arg5[%c0_8, %c0_9] : memref<1x2xf32, #tpu.memory_space<vmem>>, vector<1x2xf32>
    %33 = vector.broadcast %32 : vector<1x2xf32> to vector<24x2xf32>
    %34 = arith.addf %31, %33 : vector<24x2xf32>
    %c0_10 = arith.constant 0 : index
    %c0_11 = arith.constant 0 : index
    %35 = vector.load %arg6[%c0_10, %c0_11] : memref<24x2xf32, #tpu.memory_space<vmem>>, vector<24x2xf32>
    tpu.vector_store %arg6[%c0_10, %c0_11], %34 {strides = array<i32>} : memref<24x2xf32, #tpu.memory_space<vmem>>, vector<24x2xf32>,
    return
  }
  func.func @transform_0(%arg0: i32) -> (i32, i32) {
    %c0_i32 = arith.constant 0 : i32
    %c0_i32_0 = arith.constant 0 : i32
    return %arg0, %c0_i32 : i32, i32
  }
  func.func @transform_1(%arg0: i32) -> (i32, i32) {
    %c0_i32 = arith.constant 0 : i32
    %c0_i32_0 = arith.constant 0 : i32
    %c0_i32_1 = arith.constant 0 : i32
    return %c0_i32, %c0_i32_0 : i32, i32
  }
  func.func @transform_2(%arg0: i32) -> (i32, i32) {
    %c0_i32 = arith.constant 0 : i32
    %c0_i32_0 = arith.constant 0 : i32
    %c0_i32_1 = arith.constant 0 : i32
    return %c0_i32, %c0_i32_0 : i32, i32
  }
  func.func @transform_3(%arg0: i32) -> (i32, i32) {
    %c0_i32 = arith.constant 0 : i32
    %c0_i32_0 = arith.constant 0 : i32
    %c0_i32_1 = arith.constant 0 : i32
    return %c0_i32, %c0_i32_0 : i32, i32
  }
  func.func @transform_4(%arg0: i32) -> (i32, i32) {
    %c0_i32 = arith.constant 0 : i32
    %c0_i32_0 = arith.constant 0 : i32
    %c0_i32_1 = arith.constant 0 : i32
    return %c0_i32, %c0_i32_0 : i32, i32
  }
  func.func @transform_5(%arg0: i32) -> (i32, i32) {
    %c0_i32 = arith.constant 0 : i32
    %c0_i32_0 = arith.constant 0 : i32
    return %arg0, %c0_i32 : i32, i32
  }
}

</mosaic_0001>

<bundles_post_ra>
// kernel: tpu_custom_call.1
= control target key start
LH: loop header
LB: loop body
LE: loop exit
PB: predicated region body
PF: predicated region fallthrough
CT: control target
= control target key end

     0   :  { %s636_s18 = smov 0   ;;  %s699_s0 = inlined_call_operand.vmem [shape: f32[48,4], index: 0, kind: input, shape index: {}]   ;;  %s700_s1 = inlined_call_operand.vmem [shape: f32[4,64], index: 1, kind: input, shape index: {}]   ;;  %s701_s2 = inlined_call_operand.vmem [shape: f32[1,64], index: 2, kind: input, shape index: {}]   ;;  %s702_s3 = inlined_call_operand.vmem [shape: f32[64,2], index: 3, kind: input, shape index: {}]   ;;  %s703_s4 = inlined_call_operand.vmem [shape: f32[1,2], index: 4, kind: input, shape index: {}]   ;;  %s704_s5 = inlined_call_operand.vmem [shape: f32[48,2], index: 5, kind: output, shape index: {}]  }
   0x1 LB: > { %s498_s19 = sadd.s32 4294967295, %s597_s18   ;;  %p502_p0 = scmp.ge.s32.totalorder %s597_s18, 1  ;;  %s597_s18 = sphi %s636_s18, %s15_s18  }
   0x2   : > { %p188_p1 = scmp.lt.s32.totalorder %s597_s18, 3 }
   0x4   : > { %p189_p2 = pnand %p502_p0, %p188_p1 }
   0x5   : > { %s216_s20 = smul.u32 (!%p189_p2), 3, %s498_s19  ;;  %v599_v0 = vmov (!%p189_p2), 2   ;;  %v600_v1 = vmov (!%p189_p2), 0   ;;  %v601_v4 = vmov (!%p189_p2), 1   ;;  %v333_v5 = vld [vmem:[%s702_s3] sm:$0xff] (!%p189_p2)  ;;  %v334_v6 = vld [vmem:[%s702_s3 + $0x8] sm:$0xff] (!%p189_p2)  ;;  %v247_v21 = vlaneseq (!%p189_p2) }
   0x6   : > { %192 = sbr.rel (%p189_p2) target bundleno = 396 (0x18c), region = 40  ;;  %585 = vset.pattern.permute.xlu1 (!%p189_p2), %v599_v0  ;;  %583 = vset.pattern.permute.xlu0 (!%p189_p2), %v600_v1  ;;  %v549_v7 = vpack.c.bf16 (!%p189_p2), %v334_v6, %v333_v5  ;;  %v602_v9 = vmov (!%p189_p2), 0.0|0.0   ;;  %v335_v10 = vld [vmem:[%s702_s3 + $0x10] sm:$0xff] (!%p189_p2)  ;;  %v336_v11 = vld [vmem:[%s702_s3 + $0x18] sm:$0xff] (!%p189_p2)  ;;  %v337_v13 = vld [vmem:[%s702_s3 + $0x20] sm:$0xff] (!%p189_p2)  ;;  %v603_v15 = vmov (!%p189_p2), 3  }
   0x7   : > { %p217_p3 = scmp.lt.s32.totalorder (!%p189_p2), %s216_s20, 5  ;;  %560 = vmatprep.subr.bf16.mxu1 (!%p189_p2), %v602_v9  ;;  %548 = vmatprep.subr.bf16.mxu0 (!%p189_p2), %v602_v9  ;;  %v552_v12 = vpack.c.bf16 (!%p189_p2), %v336_v11, %v335_v10  ;;  %v338_v14 = vld [vmem:[%s702_s3 + $0x28] sm:$0xff] (!%p189_p2)  ;;  %v339_v17 = vld [vmem:[%s702_s3 + $0x30] sm:$0xff] (!%p189_p2)  ;;  %v340_v18 = vld [vmem:[%s702_s3 + $0x38] sm:$0xff] (!%p189_p2)  ;;  %vm604_vm0 = vmmov (!%p189_p2), 0   ;;  %v605_v20 = vmov (!%p189_p2), 0.0  }
   0x8   : > { %564 = vmatpush3.bf16.msra.mxu1 (!%p189_p2), %v549_v7  ;;  %550 = vmatpush3.bf16.msra.mxu0 (!%p189_p2), %v549_v7  ;;  %v555_v16 = vpack.c.bf16 (!%p189_p2), %v338_v14, %v337_v13  ;;  %v558_v19 = vpack.c.bf16 (!%p189_p2), %v340_v18, %v339_v17  ;;  %v248_v22 = vshrl.u32 (!%p189_p2), %v247_v21, 7  ;;  %v231_v27 = vld [vmem:[%s700_s1] sm:$0xf] (!%p189_p2)  ;;  %vm348_vm1 = vcmask (!%p189_p2), 523264  }
   0x9   : > { %561 = vmatprep.subr.bf16.mxu1 (!%p189_p2), %v602_v9  ;;  %551 = vmatprep.subr.bf16.mxu0 (!%p189_p2), %v602_v9  ;;  %v505_v47 = vld [vmem:[%s701_s2] ss:$0 sm:$0xff] (!%p189_p2)  ;;  %vm438_vm2 = vcmask (!%p189_p2), 15360  }
   0xa   : > { %542 = vmatprep.mubr.msk.f32.mxu1 (!%p189_p2), %vm604_vm0, %v605_v20  ;;  %539 = vmatprep.mubr.msk.f32.mxu0 (!%p189_p2), %vm604_vm0, %v605_v20  ;;  %v249_v23 = vsub.s32 (!%p189_p2), 0, %v248_v22  ;;  %v268_v24 = vsub.s32 (!%p189_p2), 1, %v248_v22  ;;  %v290_v30 = vsub.s32 (!%p189_p2), 2, %v248_v22  ;;  %v312_v35 = vsub.s32 (!%p189_p2), 3, %v248_v22 }
   0xc   : > { %565 = vmatpush3.bf16.msra.mxu1 (!%p189_p2), %v552_v12  ;;  %553 = vmatpush3.bf16.msra.mxu0 (!%p189_p2), %v552_v12  ;;  %v250_v28 = vrot.slane (!%p189_p2), %v231_v27, %v249_v23  ;;  %v269_v29 = vrot.slane (!%p189_p2), %v231_v27, %v268_v24  ;;  %v291_v36 = vrot.slane (!%p189_p2), %v231_v27, %v290_v30 }
   0xd   : > { %s706_s20 = smov (!%p217_p3, %s216_s20), 5  ;;  %562 = vmatprep.subr.bf16.mxu1 %v602_v9  ;;  %554 = vmatprep.subr.bf16.mxu0 %v602_v9  ;;  %v313_v40 = vrot.slane %v231_v27, %v312_v35 }
   0xe   : > { %s503_s21 = sshll.u32 %s706_s20, 3 }
   0xf   : > { %s220_s24 = scalar_lea.vmem %s699_s0, %s503_s21  ;;  %s226_s27 = scalar_lea.vmem %s704_s5, %s503_s21 }
  0x10   : > { %v229_v2 = vld [vmem:[%s220_s24 + $0x8] sm:$0xff]  ;;  %v228_v3 = vld [vmem:[%s220_s24] sm:$0xff]  ;;  %v230_v8 = vld [vmem:[%s220_s24 + $0x10] sm:$0xff]  ;;  %566 = vmatpush3.bf16.msra.mxu1 %v555_v16  ;;  %556 = vmatpush3.bf16.msra.mxu0 %v555_v16 }
  0x11   : > { %281 = vperm.xlu1 %585, %v229_v2   ;;  %239 = vperm.xlu0 %583, %v229_v2  }
  0x12   : > { %563 = vmatprep.subr.bf16.mxu1 %v602_v9  ;;  %557 = vmatprep.subr.bf16.mxu0 %v602_v9 }
  0x14   : > { %567 = vmatpush3.bf16.msra.mxu1 %v558_v19  ;;  %559 = vmatpush3.bf16.msra.mxu0 %v558_v19 }
  0x15   : > { %586 = vset.pattern.permute.xlu1 %v600_v1  ;;  %584 = vset.pattern.permute.xlu0 %v601_v4 }
  0x16   : > { %259 = vperm.xlu0 %584, %v229_v2   ;;  %234 = vperm.xlu1 %586, %v228_v3  }
  0x1a   : > { %255 = vperm.xlu0 %584, %v228_v3   ;;  %244 = vperm.xlu1 %586, %v230_v8  }
  0x1e   : > { %588 = vset.pattern.permute.xlu0 %v603_v15  ;;  %587 = vset.pattern.permute.xlu1 %v601_v4 }
  0x1f   : > { %303 = vperm.xlu0 %588, %v229_v2   ;;  %263 = vperm.xlu1 %587, %v230_v8  }
  0x23   : > { %589 = vset.pattern.permute.xlu1 %v599_v0  ;;  %299 = vperm.xlu0 %588, %v228_v3  }
  0x24   : > { %277 = vperm.xlu1 %589, %v228_v3  }
  0x28   : > { %285 = vperm.xlu1 %589, %v230_v8  }
  0x2c   : > { %590 = vset.pattern.permute.xlu1 %v603_v15 }
  0x2d   : > { %307 = vperm.xlu1 %590, %v230_v8   ;;  %v506_v8 = vld [vmem:[%s703_s4] ss:$0 sm:$0xff] }
  0x90   : > { %v282_v25 = vpop.permute.xlu1 %281  ;;  %v240_v26 = vpop.permute.xlu0 %239 }
  0x91   : > { %v252_v33 = vmul.f32 %v250_v28, %v240_v26  ;;  %v293_v41 = vmul.f32 %v291_v36, %v282_v25 }
  0x95   : > { %v260_v31 = vpop.permute.xlu0 %259  ;;  %v235_v32 = vpop.permute.xlu1 %234 }
  0x96   : > { %v271_v34 = vmul.f32 %v269_v29, %v260_v31  ;;  %v251_v49 = vmul.f32 %v250_v28, %v235_v32 }
  0x98   : > { %v274_v39 = vadd.f32 %v271_v34, %v252_v33 }
  0x99   : > { %v256_v37 = vpop.permute.xlu0 %255  ;;  %v245_v38 = vpop.permute.xlu1 %244 }
  0x9a   : > { %v296_v44 = vadd.f32 %v293_v41, %v274_v39  ;;  %v270_v46 = vmul.f32 %v269_v29, %v256_v37  ;;  %v253_v61 = vmul.f32 %v250_v28, %v245_v38 }
  0x9c   : > { %v273_v53 = vadd.f32 %v270_v46, %v251_v49 }
  0x9e   : > { %v304_v42 = vpop.permute.xlu0 %303  ;;  %v264_v43 = vpop.permute.xlu1 %263 }
  0x9f   : > { %v315_v45 = vmul.f32 %v313_v40, %v304_v42  ;;  %v272_v58 = vmul.f32 %v269_v29, %v264_v43 }
  0xa1   : > { %v318_v48 = vadd.f32 %v315_v45, %v296_v44  ;;  %v275_v0 = vadd.f32 %v272_v58, %v253_v61 }
  0xa2   : > { %v300_v50 = vpop.permute.xlu0 %299 }
  0xa3   : > { %v328_v51 = vadd.f32 %v505_v47, %v318_v48  ;;  %v278_v52 = vpop.permute.xlu1 %277  ;;  %v314_v55 = vmul.f32 %v313_v40, %v300_v50 }
  0xa4   : > { %v292_v54 = vmul.f32 %v291_v36, %v278_v52 }
  0xa5   : > { %v331_v56 = vmax.f32 %v328_v51, 0.0 }
  0xa6   : > { %v295_v57 = vadd.f32 %v292_v54, %v273_v53 }
  0xa7   : > { %543 = vmatmul.mubr.msk.f32.vlgmr.msra.gmra.mrb[0].mxu1 %vm348_vm1, %v331_v56  ;;  %v286_v59 = vpop.permute.xlu1 %285 }
  0xa8   : > { %v317_v60 = vadd.f32 %v314_v55, %v295_v57  ;;  %545 = vmatprep.mubr.msk.f32.mxu1 %vm604_vm0, %v605_v20  ;;  %v294_v62 = vmul.f32 %v291_v36, %v286_v59 }
  0xaa   : > { %v327_v63 = vadd.f32 %v505_v47, %v317_v60  ;;  %v297_v3 = vadd.f32 %v294_v62, %v275_v0 }
  0xac   : > { %v330_v1 = vmax.f32 %v327_v63, 0.0  ;;  %v308_v2 = vpop.permute.xlu1 %307 }
  0xad   : > { %v316_v4 = vmul.f32 %v313_v40, %v308_v2 }
  0xae   : > { %540 = vmatmul.mubr.msk.f32.vlgmr.msra.gmra.mrb[0].mxu0 %vm348_vm1, %v330_v1 }
  0xaf   : > { %v319_v5 = vadd.f32 %v316_v4, %v297_v3 }
  0xb1   : > { %v329_v6 = vadd.f32 %v505_v47, %v319_v5 }
  0xb3   : > { %v332_v7 = vmax.f32 %v329_v6, 0.0 }
  0xb5   : > { %546 = vmatmul.mubr.msk.f32.gmra.mrb[2].mxu1 %vm348_vm1, %v332_v7 }
 0x17a   : > { %v429_v9 = vpop.f32.mrb[0].mxu1 }
 0x17b   : > { %v430_v10 = vadd.f32 %v506_v8, %v429_v9  ;;  %v544_v11 = vpop.f32.mrb[1].mxu1 }
 0x17d   : > { %440 = vst.msk [vmem:[%s226_s27 + $0x8] sm:$0xff] %vm438_vm2, %v430_v10 }
 0x181   : > { %v424_v12 = vpop.f32.mrb[0].mxu0 }
 0x182   : > { %v425_v13 = vadd.f32 %v506_v8, %v424_v12  ;;  %v541_v14 = vpop.f32.mrb[1].mxu0 }
 0x184   : > { %439 = vst.msk [vmem:[%s226_s27] sm:$0xff] %vm438_vm2, %v425_v13 }
 0x188   : > { %v434_v15 = vpop.f32.mrb[2].mxu1 }
 0x189   : > { %v435_v16 = vadd.f32 %v506_v8, %v434_v15  ;;  %v547_v17 = vpop.f32.mrb[3].mxu1 }
 0x18b   : > { %441 = vst.msk [vmem:[%s226_s27 + $0x10] sm:$0xff] %vm438_vm2, %v435_v16 }
 0x18c PF: > { %s15_s18 = sadd.s32 1, %s597_s18  }
 0x18d   : > { %p12_p4 = scmp.ge.s32.totalorder %s15_s18, 4  }
 0x18f   :  { %14 = sbr.rel (!%p12_p4) target bundleno = 1 (0x1), region = 70 }

</bundles_post_ra>
